<compile_context>
chip_gen: v7x
topology: tpu7x:2x2x1
jax: 0.10.0
libtpu: 0.0.40
codegen_flags: <defaults>
</compile_context>

<pallas_src>
import jax
import jax.numpy as jnp
from jax.experimental import pallas as pl
from jax.experimental.pallas import tpu as pltpu


# Keep each output block around <= 4 MiB so 2x double-buffering fits every
# generation's default scoped-VMEM limit (incl. v5e's 16 MiB, v7x's 32 MiB).
_TARGET_BLOCK_BYTES = 4 * 1024 * 1024


def _pick_row_tile(seq_len: int) -> int:
    """Largest row tile (multiple of 8, divides seq_len) under the VMEM budget."""
    if seq_len % 8 != 0:
        # Full-extent row block is always legal under the (8,128) rule.
        return seq_len
    max_rows = max(8, _TARGET_BLOCK_BYTES // (seq_len * 4))
    for cand in (1024, 512, 256, 128, 64, 32, 16, 8):
        if cand <= max_rows and seq_len % cand == 0:
            return min(cand, seq_len)
    return seq_len


def _alibi_kernel(slopes_ref, out_ref):
    # slopes_ref: SMEM (H,) float32
    # out_ref:    VMEM (1, 1, TS, S) float32 -> rows [r*TS, (r+1)*TS) of head h
    h = pl.program_id(0)
    r = pl.program_id(1)
    ts = out_ref.shape[2]
    s = out_ref.shape[3]
    col = jax.lax.broadcasted_iota(jnp.int32, (ts, s), 1)            # j
    row = jax.lax.broadcasted_iota(jnp.int32, (ts, s), 0) + r * ts   # i (global)
    out_ref[0, 0] = (col - row).astype(jnp.float32) * slopes_ref[h]


def alibi_positional_bias(slopes: jax.Array, seq_len: int, row_tile: int | None = None) -> jax.Array:
    """Pallas implementation of AttentionLinearBiasPositionalEmbedding.forward.

    slopes: (num_heads,) float32
    returns: (1, num_heads, seq_len, seq_len) float32 with out[0,h,i,j] = (j-i)*slopes[h]
    """
    num_heads = slopes.shape[0]
    ts = row_tile if row_tile is not None else _pick_row_tile(seq_len)
    grid = (num_heads, pl.cdiv(seq_len, ts))

    return pl.pallas_call(
        _alibi_kernel,
        out_shape=jax.ShapeDtypeStruct((1, num_heads, seq_len, seq_len), jnp.float32),
        grid=grid,
        in_specs=[pl.BlockSpec(memory_space=pltpu.MemorySpace.SMEM)],
        out_specs=pl.BlockSpec((1, 1, ts, seq_len), lambda h, r: (0, h, r, 0)),
        compiler_params=pltpu.CompilerParams(
            dimension_semantics=("parallel", "parallel"),
        ),
        cost_estimate=pl.CostEstimate(
            flops=2 * num_heads * seq_len * seq_len,
            transcendentals=0,
            bytes_accessed=num_heads * seq_len * seq_len * 4,
        ),
    )(slopes.astype(jnp.float32))


def _reference(slopes: jax.Array, seq_len: int) -> jax.Array:
    ar = jnp.arange(seq_len, dtype=jnp.float32)
    bias = ar[None, :] - ar[:, None]                  # (S, S), j - i
    bias = bias[None, None, :, :]                     # (1, 1, S, S)
    return bias * slopes.reshape(1, -1, 1, 1)         # (1, H, S, S)


if __name__ == "__main__":
    num_heads = 4
    seq_len = 8

    # Deterministic parameter init matching the module: slopes = [1, 2, ..., H].
    # (PRNG key created per spec but unused since the module's init is deterministic.)
    _ = jax.random.PRNGKey(0)
    slopes = jnp.arange(1, num_heads + 1, dtype=jnp.float32)

    out = jax.block_until_ready(alibi_positional_bias(slopes, seq_len))
    ref = _reference(slopes, seq_len)
    assert out.shape == (1, num_heads, seq_len, seq_len), out.shape
    assert jnp.allclose(out, ref), "mismatch vs reference (small case)"

    # Exercise the multi-row-tile path (verifies the r*TS row-offset arithmetic).
    slopes2 = jnp.arange(1, 3, dtype=jnp.float32)
    out2 = jax.block_until_ready(alibi_positional_bias(slopes2, 64, row_tile=16))
    ref2 = _reference(slopes2, 64)
    assert out2.shape == (1, 2, 64, 64), out2.shape
    assert jnp.allclose(out2, ref2), "mismatch vs reference (tiled case)"

    print("KERNEL_OK")
</pallas_src>

<mosaic_0001>
module attributes {stable_mosaic.version = 11 : i64} {
  func.func @_alibi_kernel(%arg0: i32, %arg1: i32, %arg2: memref<4xf32, #tpu.memory_space<smem>>, %arg3: memref<1x1x8x8xf32, #tpu.memory_space<vmem>>) attributes {dimension_semantics = [#tpu.dimension_semantics<parallel>, #tpu.dimension_semantics<parallel>], iteration_bounds = array<i64: 4, 1>, scalar_prefetch = 0 : i64, scratch_operands = 0 : i64, tpu.core_type = #tpu.core_type<tc>, window_params = [{transform_indices = @transform_0, window_bounds = array<i64: 4>}, {transform_indices = @transform_1, window_bounds = array<i64: 1, 1, 8, 8>}]} {
    %0 = tpu.iota {dimensions = array<i32: 1>} : vector<8x8xi32>
    %1 = tpu.iota {dimensions = array<i32: 0>} : vector<8x8xi32>
    %c8_i32 = arith.constant 8 : i32
    %2 = arith.muli %arg1, %c8_i32 : i32
    %3 = vector.broadcast %2 : i32 to vector<8x8xi32>
    %4 = arith.addi %1, %3 : vector<8x8xi32>
    %5 = arith.subi %0, %4 : vector<8x8xi32>
    %6 = arith.sitofp %5 : vector<8x8xi32> to vector<8x8xf32>
    %7 = arith.index_cast %arg0 : i32 to index
    %8 = memref.load %arg2[%7] : memref<4xf32, #tpu.memory_space<smem>>
    %9 = vector.broadcast %8 : f32 to vector<8x8xf32>
    %10 = arith.mulf %6, %9 : vector<8x8xf32>
    %c0 = arith.constant 0 : index
    %c0_0 = arith.constant 0 : index
    %c0_1 = arith.constant 0 : index
    %c0_2 = arith.constant 0 : index
    %11 = vector.load %arg3[%c0, %c0_0, %c0_1, %c0_2] : memref<1x1x8x8xf32, #tpu.memory_space<vmem>>, vector<1x1x8x8xf32>
    %12 = vector.shape_cast %11 : vector<1x1x8x8xf32> to vector<8x8xf32>
    %13 = vector.shape_cast %10 : vector<8x8xf32> to vector<1x1x8x8xf32>
    tpu.vector_store %arg3[%c0, %c0_0, %c0_1, %c0_2], %13 {strides = array<i32>} : memref<1x1x8x8xf32, #tpu.memory_space<vmem>>, vector<1x1x8x8xf32>,
    return
  }
  func.func @transform_0(%arg0: i32, %arg1: i32) -> i32 {
    %c0_i32 = arith.constant 0 : i32
    %c0_i32_0 = arith.constant 0 : i32
    return %c0_i32 : i32
  }
  func.func @transform_1(%arg0: i32, %arg1: i32) -> (i32, i32, i32, i32) {
    %c0_i32 = arith.constant 0 : i32
    %c0_i32_0 = arith.constant 0 : i32
    %c0_i32_1 = arith.constant 0 : i32
    return %c0_i32, %arg0, %arg1, %c0_i32_0 : i32, i32, i32, i32
  }
}

</mosaic_0001>

<bundles_post_ra>
// kernel: tpu_custom_call.1
= control target key start
LH: loop header
LB: loop body
LE: loop exit
PB: predicated region body
PF: predicated region fallthrough
CT: control target
= control target key end

     0   :  { %6 = vsyncpa [#allocation4], 0  ;;  %s542_s0 = inlined_call_operand.hbm [shape: f32[4], index: 0, kind: input, shape index: {}]   ;;  %s543_s1 = inlined_call_operand.hbm [shape: f32[1,4,8,8], index: 1, kind: output, shape index: {}]  }
   0x1   :  { %7 = vsyncpa [#allocation3], 0 }
   0x2   :  { %9 = vsyncpa [#allocation3 + $0x1], 0  ;;  %s404_s6 = smov 0   ;;  %s406_s7 = smov 0  }
   0x3   :  { %s408_s8 = smov 0   ;;  %s410_s9 = smov 0  }
   0x4   :  { %s412_s10 = smov 0   ;;  %s414_s11 = smov 0  }
   0x5 LB: > { %s218_s12 = sadd.s32 4294967295, %s390_s11   ;;  %s219_s13 = sadd.s32 4294967294, %s390_s11   ;;  %s390_s11 = sphi %s414_s11, %s15_s11   ;;  %s386_s10 = sphi %s412_s10, %s552_s10   ;;  %s382_s9 = sphi %s410_s9, %s551_s9   ;;  %s378_s8 = sphi %s408_s8, %s550_s8   ;;  %s374_s7 = sphi %s406_s7, %s549_s7   ;;  %s370_s6 = sphi %s404_s6, %s548_s6  }
   0x6   : > { %s27_s14 = sadd.s32 1, %s386_s10  ;;  %s57_s15 = sadd.s32 1, %s378_s8 }
   0x7   : > { %p29_p0 = scmp.ge.s32.totalorder %s27_s14, 4  ;;  %p67_p1 = scmp.ne.s32.totalorder %s378_s8, %s374_s7 }
   0x8   : > { %p68_p2 = scmp.eq.s32.totalorder %s218_s12, 3  ;;  %p73_p3 = scmp.ne.s32.totalorder %s374_s7, %s370_s6 }
   0x9   : > { %s554_s14 = smov (%p29_p0, %s27_s14), 0  ;;  %p74_p5 = scmp.eq.s32.totalorder %s219_s13, 3 }
   0xa   : > { %p444_p4 = por %p68_p2, %p67_p1  ;;  %s52_s17 = ssub.s32 %s386_s10, %s554_s14 }
   0xb   : > { %p220_p6 = scmp.ge.s32.totalorder %s390_s11, 1  ;;  %p55_p7 = scmp.eq.s32.totalorder %s52_s17, 0 }
   0xc   : > { %p451_p8 = por %p74_p5, %p73_p3  ;;  %p81_p9 = scmp.lt.s32.totalorder %s390_s11, 5 }
   0xd   : > { %s457_s19 = scalar_select %p55_p7, %s378_s8, %s57_s15  }
   0xe   : > { %p459_p10 = pnand %p220_p6, %p81_p9  ;;  %p463_p11 = scmp.eq.s32.totalorder %s218_s12, 0 }
   0xf   : > { %s295_s24 = scalar_lea.hbm %s542_s0, 16 }
  0x10   : > { %p235_p12 = pneg %p459_p10  ;;  %p296_p0 = scmp.ne.s32.totalorder %s542_s0, %s295_s24 }
  0x11   : > { %p302_p5 = scmp.lt.u32.totalorder %s295_s24, %s542_s0 }
  0x12   : > { %p236_p13 = pnand %p463_p11, %p235_p12 }
  0x14   : > { %p297_p1 = pneg %p236_p13 }
  0x16   : > { %p298_p2 = pnand %p297_p1, %p296_p0 }
  0x18   : > { %p299_p3 = pneg %p298_p2 }
  0x1a   : > { %p304_p6 = pnand %p302_p5, %p299_p3 }
  0x1c   : > { %307 = shalt.err (!%p304_p6)
}
  0x1d   : > { %s392_s29 = smov [#allocation2]   ;;  %105 = sbr.rel (%p459_p10) target bundleno = 65 (0x41), region = 24 }
  0x1e   : > { %238 = dma.hbm_to_smem (!%p236_p13), %s542_s0, 16, %s392_s29, [#allocation4]  }
  0x24   : > { %361 = dma.done.wait (%p463_p11), [#allocation4], 16  }
  0x25   : > { %363 = vsyncadd (%p463_p11), [#allocation4], 4294967280 }
  0x26   : > { %111 = sfence }
  0x27   : > { %s118_s3 = sand.u32 1, %s374_s7   ;;  %v121_v0 = vlaneseq  ;;  %s130_s4 = sld [smem:[#allocation2 + %s382_s9]]  ;;  %vm133_vm0 = vcmask 64512  }
  0x28   : > { %s224_s5 = sshll.u32 %s118_s3, 3  ;;  %s226_s15 = sshll.u32 %s382_s9, 7 }
  0x29   : > { %v122_v1 = vand.u32 127, %v121_v0  ;;  %v124_v2 = vshrl.u32 %v121_v0, 7  ;;  %s120_s12 = scalar_lea.vmem [#allocation5], %s224_s5  ;;  %s497_s21 = scalar_lea.hbm %s543_s1, %s226_s15 }
  0x2a   : > { %s150_s13 = sshll.u32 %s120_s12, 4  ;;  %s136_s22 = scalar_lea.sflag [#allocation3], %s118_s3  ;;  %s492_s13 = int_to_ptr.vmem [resolvable:$true] %s150_s13 }
  0x2b   : > { %v128_v3 = vsub.s32 %v122_v1, %v124_v2  ;;  %s308_s23 = scalar_lea.vmem %s492_s13, 128  ;;  %s393_s9 = smov [#allocation5]  }
  0x2c   : > { %p309_p7 = scmp.ne.s32.totalorder %s492_s13, %s308_s23  ;;  %s312_s24 = sshll.u32 %s393_s9, 4  ;;  %s313_s24 = int_to_ptr.vmem [resolvable:$false] %s312_s24 }
  0x2d   : > { %v129_v4 = vcvt.s32.f32 %v128_v3  ;;  %v131_v5 = vstv %s130_s4  ;;  %s314_s25 = scalar_lea.vmem %s313_s24, 256  ;;  %p315_p11 = scmp.lt.s32.totalorder %s492_s13, %s313_s24 }
  0x2e   : > { %p310_p9 = pnand %p309_p7, %p444_p4  ;;  %p316_p12 = scmp.lt.s32.totalorder %s314_s25, %s308_s23 }
  0x2f   : > { %v132_v6 = vmul.f32 %v131_v5, %v129_v4 }
  0x30   : > { %p311_p10 = pneg %p310_p9  ;;  %p317_p13 = por %p316_p12, %p315_p11 }
  0x31   : > { %134 = vst.msk [vmem:[%s120_s12] sm:$0xff] %vm133_vm0, %v132_v6 }
  0x32   : > { %p318_p0 = pnand %p317_p13, %p311_p10 }
  0x34   : > { %321 = shalt.err (!%p318_p0)
}
  0x35   : > { %s322_s26 = scalar_lea.hbm %s497_s21, 128  ;;  %s326_s29 = scalar_lea.hbm %s543_s1, 512 }
  0x36   : > { %p323_p1 = scmp.ne.s32.totalorder %s497_s21, %s322_s26  ;;  %p327_p5 = scmp.lt.u32.totalorder %s497_s21, %s543_s1 }
  0x37   : > { %p328_p6 = scmp.lt.u32.totalorder %s326_s29, %s322_s26  ;;  %p330_p9 = scmp.lt.u32.totalorder %s322_s26, %s497_s21 }
  0x38   : > { %p324_p2 = pnand %p323_p1, %p444_p4 }
  0x39   : > { %p329_p7 = por %p328_p6, %p327_p5 }
  0x3a   : > { %p325_p3 = pneg %p324_p2 }
  0x3b   : > { %p331_p10 = por %p330_p9, %p329_p7 }
  0x3d   : > { %p332_p11 = pnand %p331_p10, %p325_p3 }
  0x3f   : > { %335 = shalt.err (!%p332_p11)
}
  0x40   : > { %233 = dma.vmem_to_hbm [thread:$0]  (%p444_p4), %s492_s13, 128, %s497_s21, %s136_s22  }
  0x41 PF: > { %p245_p12 = scmp.ge.s32.totalorder %s390_s11, 2  ;;  %s162_s3 = sand.u32 1, %s370_s6  }
  0x42   : > { %s163_s4 = scalar_lea.sflag [#allocation3], %s162_s3 }
  0x43   : > { %p240_p13 = pnand %p245_p12, %p451_p8 }
  0x45   : > { %365 = dma.done.wait (!%p240_p13), %s163_s4, 128  }
  0x46   : > { %367 = vsyncadd (!%p240_p13), %s163_s4, 4294967168  ;;  %s15_s11 = sadd.s32 1, %s390_s11   ;;  %s548_s6 = smov %s374_s7 }
  0x47   : > { %p12_p0 = scmp.ge.s32.totalorder %s15_s11, 6   ;;  %s549_s7 = smov %s378_s8 }
  0x48   : > { %s550_s8 = smov %s457_s19  ;;  %s551_s9 = smov %s386_s10 }
  0x49   : > { %s552_s10 = smov %s554_s14  ;;  %14 = sbr.rel (!%p12_p0) target bundleno = 5 (0x5), region = 61 }
  0x50   :  { %168 = vsyncpa [#allocation3], 1 }
  0x51   :  { %170 = vsyncpa [#allocation3 + $0x1], 1 }
  0x52   :  { %171 = vsyncpa [#allocation4], 1 }
  0x53   :  { %173 = vsyncpa [#allocation4 + $0x1], 1 }

</bundles_post_ra>
